<compile_context>
chip_gen: v5e
topology: v5e:2x2
jax: 0.10.0
libtpu: 0.0.40
codegen_flags: <defaults>
</compile_context>

<pallas_src>
import jax
import jax.numpy as jnp
from jax import lax
from jax.experimental import pallas as pl
from jax.experimental.pallas import tpu as pltpu

OUT_PAD = 128  # lane-dense fc2 output width (first 2 columns are the logits)


def adarcnn_kernel(x_ref, w1_ref, b1_ref, w2_ref, b2_ref,
                   fc1w_ref, fc1b_ref, fc2w_ref, fc2b_ref, out_ref, p1pad_ref):
    """Fused ADARCNN forward for one batch tile.

    x_ref    : (TB, L, K*Cin)   wrapper-side im2col of the padded input, f32
    w1_ref   : (K*Cin, F1)      conv1 weights, im2col row order k*Cin + c
    b1_ref   : (1, F1)          f32
    w2_ref   : (K, F1, F2)      conv2 weights, per-tap (in, out) matrices
    b2_ref   : (1, F2)          f32
    fc1w_ref : (Lq*F2, H)       fc1 weights, rows permuted to (l, c) order
    fc1b_ref : (1, H)           f32
    fc2w_ref : (H, OUT_PAD)     fc2 weights zero-padded to OUT_PAD lanes
    fc2b_ref : (1, OUT_PAD)     f32, zero-padded
    out_ref  : (TB, OUT_PAD)    f32 (cols [0:2] are the logits)
    p1pad_ref: (TB, Lh+K-1, F1) persistent VMEM scratch (conv2 halo)
    """
    TB, L, _ = x_ref.shape
    F1 = w1_ref.shape[1]
    K, _, F2 = w2_ref.shape
    Lh = L // 2                 # after pool1
    Lq = Lh // 2                # after pool2
    pad = (K - 1) // 2
    cdt = w1_ref.dtype          # MXU operand dtype (f32 or bf16)

    # Zero the conv2 halo rows once; the scratch persists across grid steps so
    # they stay zero afterwards.
    @pl.when(pl.program_id(0) == 0)
    def _():
        p1pad_ref[:, :pad, :] = jnp.zeros((TB, pad, F1), p1pad_ref.dtype)
        p1pad_ref[:, pad + Lh:, :] = jnp.zeros((TB, pad, F1), p1pad_ref.dtype)

    # ---- conv1 + ReLU: one matmul over the wrapper-built im2col rows ----
    x = x_ref[...].astype(cdt)                                      # (TB, L, K*Cin)
    acc1 = lax.dot_general(x, w1_ref[...], (((2,), (0,)), ((), ())),
                           preferred_element_type=jnp.float32)
    h1 = jnp.maximum(acc1 + b1_ref[...], 0.0)                       # (TB, L, F1) f32

    # ---- maxpool1 (k=2, s=2) ----
    p1 = jnp.max(h1.reshape(TB, Lh, 2, F1), axis=2)                 # (TB, Lh, F1) f32

    # ---- conv2 + ReLU: K accumulated per-tap dots against the padded scratch ----
    p1pad_ref[:, pad:pad + Lh, :] = p1.astype(p1pad_ref.dtype)
    acc2 = jnp.zeros((TB, Lh, F2), jnp.float32)
    for k in range(K):
        acc2 = acc2 + lax.dot_general(p1pad_ref[:, k:k + Lh, :], w2_ref[k],
                                      (((2,), (0,)), ((), ())),
                                      preferred_element_type=jnp.float32)
    h2 = jnp.maximum(acc2 + b2_ref[...], 0.0)                       # (TB, Lh, F2) f32

    # ---- maxpool2 + flatten (channel-major order handled by fc1 row permute) ----
    p2 = jnp.max(h2.reshape(TB, Lq, 2, F2), axis=2).reshape(TB, Lq * F2)

    # ---- fc1 + ReLU ----
    z1 = jnp.dot(p2.astype(cdt), fc1w_ref[...],
                 preferred_element_type=jnp.float32) + fc1b_ref[...]
    z1 = jnp.maximum(z1, 0.0)

    # dropout(p=0.3): identity at inference (PyTorch eval mode)
    # TODO(synk): training-mode torch Dropout RNG has no bit-exact Pallas equivalent.

    # ---- fc2: lane-dense (OUT_PAD-wide) store; wrapper slices [:, :2] ----
    out_ref[...] = (jnp.dot(z1.astype(cdt), fc2w_ref[...],
                            preferred_element_type=jnp.float32)
                    + fc2b_ref[...]).astype(out_ref.dtype)


def adarcnn_forward(x_ncl, params, *, dtype=jnp.float32, batch_tile=None):
    """x_ncl: (B, Cin, Lin) in PyTorch NCL layout. params in PyTorch conventions.

    dtype: MXU operand dtype for weights / in-kernel dot operands (bf16 is
    MXU-native on v5e/v6e/v7x); the input stays f32 at the boundary and all
    accumulation / ReLU / pooling stays f32.
    batch_tile: rows per grid step. Default: whole batch for B<=16, otherwise
    the largest divisor of B that is <= min(128, B//2) (keeps >=2 grid steps so
    v7x megacore sharding applies; 128-row tiles fit v5e's default scoped VMEM).
    """
    w1, b1, w2, b2, fw1, fb1, fw2, fb2 = params
    B, Cin, Lin = x_ncl.shape
    F1, _, K = w1.shape
    F2 = w2.shape[0]
    H = fw1.shape[0]
    pad = (K - 1) // 2
    L = Lin
    Lh = L // 2
    Lq = Lh // 2
    assert L % 4 == 0, "two exact stride-2 pools require Lin % 4 == 0"
    assert fw1.shape[1] == F2 * Lq, "fc1 in-features must equal (Lin//4) * 2*num_filters"

    # ---- batch tile selection ----
    if batch_tile is None:
        if B <= 16:
            batch_tile = B
        else:
            cap = min(128, B // 2)
            batch_tile = max(d for d in range(1, cap + 1) if B % d == 0)
    TB = batch_tile
    assert B % TB == 0, "batch must be divisible by the batch tile"
    grid = (B // TB,)

    # ---- glue (done once, outside the kernel): channels-last + im2col layouts ----
    x_blc = jnp.transpose(x_ncl, (0, 2, 1)).astype(jnp.float32)         # (B, L, Cin)
    x_pad = jnp.pad(x_blc, ((0, 0), (pad, pad), (0, 0)))                # (B, L+K-1, Cin)
    # conv1 im2col: column k*Cin + c  ==  x_pad[:, l+k, c]
    x_im2col = jnp.concatenate([x_pad[:, k:k + L, :] for k in range(K)],
                               axis=-1)                                 # (B, L, K*Cin)
    w1_k = jnp.transpose(w1, (2, 1, 0)).reshape(K * Cin, F1).astype(dtype)
    w2_k = jnp.transpose(w2, (2, 1, 0)).astype(dtype)                   # (K, F1, F2)
    # PyTorch flatten of (B, F2, Lq) is channel-major (col = c*Lq + l); the kernel
    # flattens channels-last (col = l*F2 + c) -> permute fc1 rows accordingly.
    fw1_k = jnp.transpose(fw1.reshape(H, F2, Lq), (2, 1, 0)).reshape(Lq * F2, H).astype(dtype)
    # fc2 zero-padded to OUT_PAD output lanes for an unmasked, lane-dense store.
    fw2_k = jnp.zeros((H, OUT_PAD), dtype).at[:, :2].set(fw2.T.astype(dtype))
    b1_k = b1.reshape(1, F1).astype(jnp.float32)
    b2_k = b2.reshape(1, F2).astype(jnp.float32)
    fb1_k = fb1.reshape(1, H).astype(jnp.float32)
    fb2_k = jnp.zeros((1, OUT_PAD), jnp.float32).at[0, :2].set(fb2.astype(jnp.float32))

    operands = (x_im2col, w1_k, b1_k, w2_k, b2_k, fw1_k, fb1_k, fw2_k, fb2_k)

    def full_spec(shape):
        n = len(shape)
        return pl.BlockSpec(shape, lambda i, _n=n: (0,) * _n)

    flops = 2 * B * (L * (K * Cin) * F1
                     + Lh * (K * F1) * F2
                     + (Lq * F2) * H
                     + H * OUT_PAD)
    bytes_accessed = (sum(int(a.size) * a.dtype.itemsize for a in operands)
                      + B * OUT_PAD * 4)

    out_full = pl.pallas_call(
        adarcnn_kernel,
        out_shape=jax.ShapeDtypeStruct((B, OUT_PAD), jnp.float32),
        grid=grid,
        in_specs=[
            pl.BlockSpec((TB, L, K * Cin), lambda i: (i, 0, 0)),   # batch-tiled im2col
            full_spec((K * Cin, F1)),
            full_spec((1, F1)),
            full_spec((K, F1, F2)),
            full_spec((1, F2)),
            full_spec((Lq * F2, H)),
            full_spec((1, H)),
            full_spec((H, OUT_PAD)),
            full_spec((1, OUT_PAD)),
        ],
        out_specs=pl.BlockSpec((TB, OUT_PAD), lambda i: (i, 0)),
        scratch_shapes=[pltpu.VMEM((TB, Lh + K - 1, F1), dtype)],
        compiler_params=pltpu.CompilerParams(
            dimension_semantics=("parallel",)),
        cost_estimate=pl.CostEstimate(flops=flops, transcendentals=0,
                                      bytes_accessed=bytes_accessed),
    )(*operands)

    return out_full[:, :2]


def reference_forward(x_ncl, params):
    """Pure-JAX reference in PyTorch conventions (NCL)."""
    w1, b1, w2, b2, fw1, fb1, fw2, fb2 = params
    y = lax.conv_general_dilated(x_ncl, w1, (1,), [(2, 2)],
                                 dimension_numbers=("NCH", "OIH", "NCH"))
    y = jnp.maximum(y + b1[None, :, None], 0.0)
    y = jnp.maximum(y[:, :, 0::2], y[:, :, 1::2])                      # maxpool(2,2)
    y = lax.conv_general_dilated(y, w2, (1,), [(2, 2)],
                                 dimension_numbers=("NCH", "OIH", "NCH"))
    y = jnp.maximum(y + b2[None, :, None], 0.0)
    y = jnp.maximum(y[:, :, 0::2], y[:, :, 1::2])                      # maxpool(2,2)
    y = y.reshape(y.shape[0], -1)                                      # torch .view(B, -1)
    y = jnp.maximum(y @ fw1.T + fb1, 0.0)                              # fc1 + relu
    return y @ fw2.T + fb2                                             # fc2


if __name__ == "__main__":
    # Small shapes consistent with the module:
    # input_size=4, seq_length=8, num_filters=8, kernel_size=5, hidden_dim=32, batch=2.
    # fc1 sizing (seq_length//2 * 2*num_filters) implies the input length is
    # 2*seq_length = 16 (two stride-2 pools: 16 -> 8 -> 4 = seq_length//2).
    B, Cin, seq_length = 2, 4, 8
    F1, K, H = 8, 5, 32
    F2 = 2 * F1
    Lin = 2 * seq_length
    Lq = Lin // 4

    key = jax.random.PRNGKey(0)
    ks = jax.random.split(key, 9)
    x = jax.random.normal(ks[0], (B, Cin, Lin), jnp.float32)
    w1 = jax.random.normal(ks[1], (F1, Cin, K), jnp.float32) * 0.3
    b1 = jax.random.normal(ks[2], (F1,), jnp.float32) * 0.1
    w2 = jax.random.normal(ks[3], (F2, F1, K), jnp.float32) * 0.2
    b2 = jax.random.normal(ks[4], (F2,), jnp.float32) * 0.1
    fw1 = jax.random.normal(ks[5], (H, F2 * Lq), jnp.float32) * 0.1
    fb1 = jax.random.normal(ks[6], (H,), jnp.float32) * 0.1
    fw2 = jax.random.normal(ks[7], (2, H), jnp.float32) * 0.1
    fb2 = jax.random.normal(ks[8], (2,), jnp.float32) * 0.1
    params = (w1, b1, w2, b2, fw1, fb1, fw2, fb2)

    ref = jax.block_until_ready(reference_forward(x, params))

    # f32 operands: strict numerical parity with the PyTorch-convention reference.
    out = jax.block_until_ready(adarcnn_forward(x, params, dtype=jnp.float32))
    assert out.shape == (B, 2) and out.dtype == jnp.float32
    assert jnp.allclose(out, ref, atol=1e-3, rtol=1e-3), (out, ref)

    # bf16 operands (MXU-native on v5e/v6e/v7x), f32 accumulation: loose tolerance.
    out_bf16 = jax.block_until_ready(adarcnn_forward(x, params, dtype=jnp.bfloat16))
    assert out_bf16.shape == (B, 2) and out_bf16.dtype == jnp.float32
    assert jnp.allclose(out_bf16, ref, atol=5e-2, rtol=5e-2), (out_bf16, ref)

    # Multi-step grid path (batch tiling + persistent scratch halo reuse).
    Bb = 32
    xb = jax.random.normal(jax.random.PRNGKey(1), (Bb, Cin, Lin), jnp.float32)
    refb = jax.block_until_ready(reference_forward(xb, params))
    outb = jax.block_until_ready(adarcnn_forward(xb, params, dtype=jnp.float32))
    assert outb.shape == (Bb, 2)
    assert jnp.allclose(outb, refb, atol=1e-3, rtol=1e-3), (outb, refb)

    print("KERNEL_OK")
</pallas_src>

<mosaic_0001>
module attributes {stable_mosaic.version = 11 : i64} {
  func.func @adarcnn_kernel(%arg0: i32, %arg1: memref<2x16x20xf32, #tpu.memory_space<vmem>>, %arg2: memref<20x8xf32, #tpu.memory_space<vmem>>, %arg3: memref<1x8xf32, #tpu.memory_space<vmem>>, %arg4: memref<5x8x16xf32, #tpu.memory_space<vmem>>, %arg5: memref<1x16xf32, #tpu.memory_space<vmem>>, %arg6: memref<64x32xf32, #tpu.memory_space<vmem>>, %arg7: memref<1x32xf32, #tpu.memory_space<vmem>>, %arg8: memref<32x128xf32, #tpu.memory_space<vmem>>, %arg9: memref<1x128xf32, #tpu.memory_space<vmem>>, %arg10: memref<2x128xf32, #tpu.memory_space<vmem>>, %arg11: memref<2x12x8xf32, #tpu.memory_space<vmem>>) attributes {dimension_semantics = [#tpu.dimension_semantics<parallel>], iteration_bounds = array<i64: 1>, scalar_prefetch = 0 : i64, scratch_operands = 1 : i64, tpu.core_type = #tpu.core_type<tc>, window_params = [{transform_indices = @transform_0, window_bounds = array<i64: 2, 16, 20>}, {pipeline_mode = #tpu.pipeline_mode<synchronous>, transform_indices = @transform_1, window_bounds = array<i64: 20, 8>}, {pipeline_mode = #tpu.pipeline_mode<synchronous>, transform_indices = @transform_2, window_bounds = array<i64: 1, 8>}, {pipeline_mode = #tpu.pipeline_mode<synchronous>, transform_indices = @transform_3, window_bounds = array<i64: 5, 8, 16>}, {pipeline_mode = #tpu.pipeline_mode<synchronous>, transform_indices = @transform_4, window_bounds = array<i64: 1, 16>}, {pipeline_mode = #tpu.pipeline_mode<synchronous>, transform_indices = @transform_5, window_bounds = array<i64: 64, 32>}, {pipeline_mode = #tpu.pipeline_mode<synchronous>, transform_indices = @transform_6, window_bounds = array<i64: 1, 32>}, {pipeline_mode = #tpu.pipeline_mode<synchronous>, transform_indices = @transform_7, window_bounds = array<i64: 32, 128>}, {pipeline_mode = #tpu.pipeline_mode<synchronous>, transform_indices = @transform_8, window_bounds = array<i64: 1, 128>}, {transform_indices = @transform_9, window_bounds = array<i64: 2, 128>}]} {
    %c0_i32 = arith.constant 0 : i32
    %0 = arith.cmpi eq, %arg0, %c0_i32 : i32
    %1 = arith.extui %0 : i1 to i32
    %c0_i32_0 = arith.constant 0 : i32
    %2 = arith.cmpi ne, %1, %c0_i32_0 : i32
    scf.if %2 {
      %cst_61 = arith.constant 0.000000e+00 : f32
      %63 = vector.broadcast %cst_61 : f32 to vector<2x2x8xf32>
      %c0_62 = arith.constant 0 : index
      %c0_63 = arith.constant 0 : index
      %c0_64 = arith.constant 0 : index
      %64 = vector.load %arg11[%c0_62, %c0_63, %c0_64] : memref<2x12x8xf32, #tpu.memory_space<vmem>>, vector<2x2x8xf32>
      tpu.vector_store %arg11[%c0_62, %c0_63, %c0_64], %63 {strides = array<i32>} : memref<2x12x8xf32, #tpu.memory_space<vmem>>, vector<2x2x8xf32>,
      %cst_65 = arith.constant 0.000000e+00 : f32
      %65 = vector.broadcast %cst_65 : f32 to vector<2x2x8xf32>
      %c0_66 = arith.constant 0 : index
      %c10 = arith.constant 10 : index
      %c0_67 = arith.constant 0 : index
      %66 = vector.load %arg11[%c0_66, %c10, %c0_67] : memref<2x12x8xf32, #tpu.memory_space<vmem>>, vector<2x2x8xf32>
      tpu.vector_store %arg11[%c0_66, %c10, %c0_67], %65 {strides = array<i32>} : memref<2x12x8xf32, #tpu.memory_space<vmem>>, vector<2x2x8xf32>,
    } else {
    }
    %c0 = arith.constant 0 : index
    %c0_1 = arith.constant 0 : index
    %c0_2 = arith.constant 0 : index
    %3 = vector.load %arg1[%c0, %c0_1, %c0_2] : memref<2x16x20xf32, #tpu.memory_space<vmem>>, vector<2x16x20xf32>
    %c0_3 = arith.constant 0 : index
    %c0_4 = arith.constant 0 : index
    %4 = vector.load %arg2[%c0_3, %c0_4] : memref<20x8xf32, #tpu.memory_space<vmem>>, vector<20x8xf32>
    %cst = arith.constant dense<0.000000e+00> : vector<2x16x8xf32>
    %5 = tpu.matmul %3, %4, %cst {dimension_numbers = #tpu.dot_dimension_numbers<[2], [0], [0, 1], [1], [0, 0, 0, 1, 1, 1], [], []>} : vector<2x16x20xf32>, vector<20x8xf32>, vector<2x16x8xf32> -> vector<2x16x8xf32>
    %c0_5 = arith.constant 0 : index
    %c0_6 = arith.constant 0 : index
    %6 = vector.load %arg3[%c0_5, %c0_6] : memref<1x8xf32, #tpu.memory_space<vmem>>, vector<1x8xf32>
    %7 = vector.shape_cast %6 : vector<1x8xf32> to vector<1x1x8xf32>
    %8 = vector.broadcast %7 : vector<1x1x8xf32> to vector<2x16x8xf32>
    %9 = arith.addf %5, %8 : vector<2x16x8xf32>
    %cst_7 = arith.constant 0.000000e+00 : f32
    %10 = vector.broadcast %cst_7 : f32 to vector<2x16x8xf32>
    %11 = arith.maximumf %9, %10 : vector<2x16x8xf32>
    %12 = vector.shape_cast %11 : vector<2x16x8xf32> to vector<2x8x2x8xf32>
    %cst_8 = arith.constant dense<0xFF800000> : vector<2x8x8xf32>
    %13 = vector.multi_reduction <maximumf>, %12, %cst_8 [2] : vector<2x8x2x8xf32> to vector<2x8x8xf32>
    %c0_9 = arith.constant 0 : index
    %c2 = arith.constant 2 : index
    %c0_10 = arith.constant 0 : index
    %14 = vector.load %arg11[%c0_9, %c2, %c0_10] : memref<2x12x8xf32, #tpu.memory_space<vmem>>, vector<2x8x8xf32>
    tpu.vector_store %arg11[%c0_9, %c2, %c0_10], %13 {strides = array<i32>} : memref<2x12x8xf32, #tpu.memory_space<vmem>>, vector<2x8x8xf32>,
    %cst_11 = arith.constant 0.000000e+00 : f32
    %15 = vector.broadcast %cst_11 : f32 to vector<2x8x16xf32>
    %c0_12 = arith.constant 0 : index
    %c0_13 = arith.constant 0 : index
    %c0_14 = arith.constant 0 : index
    %16 = vector.load %arg11[%c0_12, %c0_13, %c0_14] : memref<2x12x8xf32, #tpu.memory_space<vmem>>, vector<2x8x8xf32>
    %c0_15 = arith.constant 0 : index
    %c0_16 = arith.constant 0 : index
    %c0_17 = arith.constant 0 : index
    %17 = vector.load %arg4[%c0_15, %c0_16, %c0_17] : memref<5x8x16xf32, #tpu.memory_space<vmem>>, vector<1x8x16xf32>
    %18 = vector.shape_cast %17 : vector<1x8x16xf32> to vector<8x16xf32>
    %cst_18 = arith.constant dense<0.000000e+00> : vector<2x8x16xf32>
    %19 = tpu.matmul %16, %18, %cst_18 {dimension_numbers = #tpu.dot_dimension_numbers<[2], [0], [0, 1], [1], [0, 0, 0, 1, 1, 1], [], []>} : vector<2x8x8xf32>, vector<8x16xf32>, vector<2x8x16xf32> -> vector<2x8x16xf32>
    %20 = arith.addf %15, %19 : vector<2x8x16xf32>
    %c0_19 = arith.constant 0 : index
    %c1 = arith.constant 1 : index
    %c0_20 = arith.constant 0 : index
    %21 = vector.load %arg11[%c0_19, %c1, %c0_20] : memref<2x12x8xf32, #tpu.memory_space<vmem>>, vector<2x8x8xf32>
    %c1_21 = arith.constant 1 : index
    %c0_22 = arith.constant 0 : index
    %c0_23 = arith.constant 0 : index
    %22 = vector.load %arg4[%c1_21, %c0_22, %c0_23] : memref<5x8x16xf32, #tpu.memory_space<vmem>>, vector<1x8x16xf32>
    %23 = vector.shape_cast %22 : vector<1x8x16xf32> to vector<8x16xf32>
    %cst_24 = arith.constant dense<0.000000e+00> : vector<2x8x16xf32>
    %24 = tpu.matmul %21, %23, %cst_24 {dimension_numbers = #tpu.dot_dimension_numbers<[2], [0], [0, 1], [1], [0, 0, 0, 1, 1, 1], [], []>} : vector<2x8x8xf32>, vector<8x16xf32>, vector<2x8x16xf32> -> vector<2x8x16xf32>
    %25 = arith.addf %20, %24 : vector<2x8x16xf32>
    %c0_25 = arith.constant 0 : index
    %c2_26 = arith.constant 2 : index
    %c0_27 = arith.constant 0 : index
    %26 = vector.load %arg11[%c0_25, %c2_26, %c0_27] : memref<2x12x8xf32, #tpu.memory_space<vmem>>, vector<2x8x8xf32>
    %c2_28 = arith.constant 2 : index
    %c0_29 = arith.constant 0 : index
    %c0_30 = arith.constant 0 : index
    %27 = vector.load %arg4[%c2_28, %c0_29, %c0_30] : memref<5x8x16xf32, #tpu.memory_space<vmem>>, vector<1x8x16xf32>
    %28 = vector.shape_cast %27 : vector<1x8x16xf32> to vector<8x16xf32>
    %cst_31 = arith.constant dense<0.000000e+00> : vector<2x8x16xf32>
    %29 = tpu.matmul %26, %28, %cst_31 {dimension_numbers = #tpu.dot_dimension_numbers<[2], [0], [0, 1], [1], [0, 0, 0, 1, 1, 1], [], []>} : vector<2x8x8xf32>, vector<8x16xf32>, vector<2x8x16xf32> -> vector<2x8x16xf32>
    %30 = arith.addf %25, %29 : vector<2x8x16xf32>
    %c0_32 = arith.constant 0 : index
    %c3 = arith.constant 3 : index
    %c0_33 = arith.constant 0 : index
    %31 = vector.load %arg11[%c0_32, %c3, %c0_33] : memref<2x12x8xf32, #tpu.memory_space<vmem>>, vector<2x8x8xf32>
    %c3_34 = arith.constant 3 : index
    %c0_35 = arith.constant 0 : index
    %c0_36 = arith.constant 0 : index
    %32 = vector.load %arg4[%c3_34, %c0_35, %c0_36] : memref<5x8x16xf32, #tpu.memory_space<vmem>>, vector<1x8x16xf32>
    %33 = vector.shape_cast %32 : vector<1x8x16xf32> to vector<8x16xf32>
    %cst_37 = arith.constant dense<0.000000e+00> : vector<2x8x16xf32>
    %34 = tpu.matmul %31, %33, %cst_37 {dimension_numbers = #tpu.dot_dimension_numbers<[2], [0], [0, 1], [1], [0, 0, 0, 1, 1, 1], [], []>} : vector<2x8x8xf32>, vector<8x16xf32>, vector<2x8x16xf32> -> vector<2x8x16xf32>
    %35 = arith.addf %30, %34 : vector<2x8x16xf32>
    %c0_38 = arith.constant 0 : index
    %c4 = arith.constant 4 : index
    %c0_39 = arith.constant 0 : index
    %36 = vector.load %arg11[%c0_38, %c4, %c0_39] : memref<2x12x8xf32, #tpu.memory_space<vmem>>, vector<2x8x8xf32>
    %c4_40 = arith.constant 4 : index
    %c0_41 = arith.constant 0 : index
    %c0_42 = arith.constant 0 : index
    %37 = vector.load %arg4[%c4_40, %c0_41, %c0_42] : memref<5x8x16xf32, #tpu.memory_space<vmem>>, vector<1x8x16xf32>
    %38 = vector.shape_cast %37 : vector<1x8x16xf32> to vector<8x16xf32>
    %cst_43 = arith.constant dense<0.000000e+00> : vector<2x8x16xf32>
    %39 = tpu.matmul %36, %38, %cst_43 {dimension_numbers = #tpu.dot_dimension_numbers<[2], [0], [0, 1], [1], [0, 0, 0, 1, 1, 1], [], []>} : vector<2x8x8xf32>, vector<8x16xf32>, vector<2x8x16xf32> -> vector<2x8x16xf32>
    %40 = arith.addf %35, %39 : vector<2x8x16xf32>
    %c0_44 = arith.constant 0 : index
    %c0_45 = arith.constant 0 : index
    %41 = vector.load %arg5[%c0_44, %c0_45] : memref<1x16xf32, #tpu.memory_space<vmem>>, vector<1x16xf32>
    %42 = vector.shape_cast %41 : vector<1x16xf32> to vector<1x1x16xf32>
    %43 = vector.broadcast %42 : vector<1x1x16xf32> to vector<2x8x16xf32>
    %44 = arith.addf %40, %43 : vector<2x8x16xf32>
    %cst_46 = arith.constant 0.000000e+00 : f32
    %45 = vector.broadcast %cst_46 : f32 to vector<2x8x16xf32>
    %46 = arith.maximumf %44, %45 : vector<2x8x16xf32>
    %47 = vector.shape_cast %46 : vector<2x8x16xf32> to vector<2x4x2x16xf32>
    %cst_47 = arith.constant dense<0xFF800000> : vector<2x4x16xf32>
    %48 = vector.multi_reduction <maximumf>, %47, %cst_47 [2] : vector<2x4x2x16xf32> to vector<2x4x16xf32>
    %49 = vector.shape_cast %48 : vector<2x4x16xf32> to vector<2x64xf32>
    %c0_48 = arith.constant 0 : index
    %c0_49 = arith.constant 0 : index
    %50 = vector.load %arg6[%c0_48, %c0_49] : memref<64x32xf32, #tpu.memory_space<vmem>>, vector<64x32xf32>
    %cst_50 = arith.constant dense<0.000000e+00> : vector<2x32xf32>
    %51 = tpu.matmul %49, %50, %cst_50 {dimension_numbers = #tpu.dot_dimension_numbers<[1], [0], [0], [1], [0, 0, 1, 1], [], []>} : vector<2x64xf32>, vector<64x32xf32>, vector<2x32xf32> -> vector<2x32xf32>
    %c0_51 = arith.constant 0 : index
    %c0_52 = arith.constant 0 : index
    %52 = vector.load %arg7[%c0_51, %c0_52] : memref<1x32xf32, #tpu.memory_space<vmem>>, vector<1x32xf32>
    %53 = vector.broadcast %52 : vector<1x32xf32> to vector<2x32xf32>
    %54 = arith.addf %51, %53 : vector<2x32xf32>
    %cst_53 = arith.constant 0.000000e+00 : f32
    %55 = vector.broadcast %cst_53 : f32 to vector<2x32xf32>
    %56 = arith.maximumf %54, %55 : vector<2x32xf32>
    %c0_54 = arith.constant 0 : index
    %c0_55 = arith.constant 0 : index
    %57 = vector.load %arg8[%c0_54, %c0_55] : memref<32x128xf32, #tpu.memory_space<vmem>>, vector<32x128xf32>
    %cst_56 = arith.constant dense<0.000000e+00> : vector<2x128xf32>
    %58 = tpu.matmul %56, %57, %cst_56 {dimension_numbers = #tpu.dot_dimension_numbers<[1], [0], [0], [1], [0, 0, 1, 1], [], []>} : vector<2x32xf32>, vector<32x128xf32>, vector<2x128xf32> -> vector<2x128xf32>
    %c0_57 = arith.constant 0 : index
    %c0_58 = arith.constant 0 : index
    %59 = vector.load %arg9[%c0_57, %c0_58] : memref<1x128xf32, #tpu.memory_space<vmem>>, vector<1x128xf32>
    %60 = vector.broadcast %59 : vector<1x128xf32> to vector<2x128xf32>
    %61 = arith.addf %58, %60 : vector<2x128xf32>
    %c0_59 = arith.constant 0 : index
    %c0_60 = arith.constant 0 : index
    %62 = vector.load %arg10[%c0_59, %c0_60] : memref<2x128xf32, #tpu.memory_space<vmem>>, vector<2x128xf32>
    tpu.vector_store %arg10[%c0_59, %c0_60], %61 {strides = array<i32>} : memref<2x128xf32, #tpu.memory_space<vmem>>, vector<2x128xf32>,
    return
  }
  func.func @transform_0(%arg0: i32) -> (i32, i32, i32) {
    %c0_i32 = arith.constant 0 : i32
    %c0_i32_0 = arith.constant 0 : i32
    %c0_i32_1 = arith.constant 0 : i32
    return %arg0, %c0_i32, %c0_i32_0 : i32, i32, i32
  }
  func.func @transform_1(%arg0: i32) -> (i32, i32) {
    %c0_i32 = arith.constant 0 : i32
    %c0_i32_0 = arith.constant 0 : i32
    %c0_i32_1 = arith.constant 0 : i32
    return %c0_i32, %c0_i32_0 : i32, i32
  }
  func.func @transform_2(%arg0: i32) -> (i32, i32) {
    %c0_i32 = arith.constant 0 : i32
    %c0_i32_0 = arith.constant 0 : i32
    %c0_i32_1 = arith.constant 0 : i32
    return %c0_i32, %c0_i32_0 : i32, i32
  }
  func.func @transform_3(%arg0: i32) -> (i32, i32, i32) {
    %c0_i32 = arith.constant 0 : i32
    %c0_i32_0 = arith.constant 0 : i32
    %c0_i32_1 = arith.constant 0 : i32
    %c0_i32_2 = arith.constant 0 : i32
    return %c0_i32, %c0_i32_0, %c0_i32_1 : i32, i32, i32
  }
  func.func @transform_4(%arg0: i32) -> (i32, i32) {
    %c0_i32 = arith.constant 0 : i32
    %c0_i32_0 = arith.constant 0 : i32
    %c0_i32_1 = arith.constant 0 : i32
    return %c0_i32, %c0_i32_0 : i32, i32
  }
  func.func @transform_5(%arg0: i32) -> (i32, i32) {
    %c0_i32 = arith.constant 0 : i32
    %c0_i32_0 = arith.constant 0 : i32
    %c0_i32_1 = arith.constant 0 : i32
    return %c0_i32, %c0_i32_0 : i32, i32
  }
  func.func @transform_6(%arg0: i32) -> (i32, i32) {
    %c0_i32 = arith.constant 0 : i32
    %c0_i32_0 = arith.constant 0 : i32
    %c0_i32_1 = arith.constant 0 : i32
    return %c0_i32, %c0_i32_0 : i32, i32
  }
  func.func @transform_7(%arg0: i32) -> (i32, i32) {
    %c0_i32 = arith.constant 0 : i32
    %c0_i32_0 = arith.constant 0 : i32
    %c0_i32_1 = arith.constant 0 : i32
    return %c0_i32, %c0_i32_0 : i32, i32
  }
  func.func @transform_8(%arg0: i32) -> (i32, i32) {
    %c0_i32 = arith.constant 0 : i32
    %c0_i32_0 = arith.constant 0 : i32
    %c0_i32_1 = arith.constant 0 : i32
    return %c0_i32, %c0_i32_0 : i32, i32
  }
  func.func @transform_9(%arg0: i32) -> (i32, i32) {
    %c0_i32 = arith.constant 0 : i32
    %c0_i32_0 = arith.constant 0 : i32
    return %arg0, %c0_i32 : i32, i32
  }
}

</mosaic_0001>

<bundles_post_ra>
// kernel: tpu_custom_call.1
= control target key start
LH: loop header
LB: loop body
LE: loop exit
PB: predicated region body
PF: predicated region fallthrough
CT: control target
= control target key end

     0   :  { %14 = vsyncpa [#allocation4], 0  ;;  %s989_s0 = inlined_call_operand.vmem [shape: f32[2,16,20], index: 0, kind: input, shape index: {}]   ;;  %s990_s1 = inlined_call_operand.vmem [shape: f32[20,8], index: 1, kind: input, shape index: {}]   ;;  %s991_s2 = inlined_call_operand.vmem [shape: f32[1,8], index: 2, kind: input, shape index: {}]   ;;  %s992_s3 = inlined_call_operand.vmem [shape: f32[5,8,16], index: 3, kind: input, shape index: {}]   ;;  %s993_s4 = inlined_call_operand.vmem [shape: f32[1,16], index: 4, kind: input, shape index: {}]   ;;  %s994_s5 = inlined_call_operand.vmem [shape: f32[64,32], index: 5, kind: input, shape index: {}]   ;;  %s995_s6 = inlined_call_operand.vmem [shape: f32[1,32], index: 6, kind: input, shape index: {}]   ;;  %s996_s7 = inlined_call_operand.hbm [shape: f32[32,128], index: 7, kind: input, shape index: {}]   ;;  %s997_s8 = inlined_call_operand.vmem [shape: f32[1,128], index: 8, kind: input, shape index: {}]   ;;  %s998_s9 = inlined_call_operand.hbm [shape: f32[2,128], index: 9, kind: output, shape index: {}]  }
   0x1   :  { %15 = vsyncpa [#allocation5], 0  ;;  %s34_s11 = sshll.u32 %s996_s7, 4  ;;  %s783_s12 = smov [#allocation3]   ;;  %s35_s11 = int_to_ptr.hbm [resolvable:$true] %s34_s11 }
   0x2   :  { %s36_s13 = sshll.u32 %s783_s12, 4  ;;  %s784_s14 = smov 128   ;;  %s37_s13 = int_to_ptr.vmem [resolvable:$true] %s36_s13 }
   0x3   :  { %s785_s15 = smov 8  }
   0x4   :  { %42 = dma.hbm_to_vmem [thread:$0]  %s35_s11, 512, %s37_s13, [#allocation4], %s784_s14, %s784_s14, %s785_s15  }
   0x5   :  { %779 = dma.done.wait [#allocation4], 512  }
   0x6   :  { %780 = vsyncadd [#allocation4], 4294966784  ;;  %vm82_vm0 = vcmask 1043456   ;;  %v64_v0 = vld [vmem:[%s990_s1 + $0x10] sm:$0xf]  ;;  %v63_v1 = vld [vmem:[%s990_s1 + $0x8] sm:$0xff] }
   0x7   :  { %696 = vmatpush.msk.msra.mxu0 %vm82_vm0, %v64_v0  ;;  %v62_v2 = vld [vmem:[%s990_s1] sm:$0xff]  ;;  %vm69_vm1 = vcmask 162816   ;;  %v59_v4 = vld [vmem:[%s989_s0 + $0x8] sm:$0xff]  ;;  %v60_v5 = vld [vmem:[%s989_s0 + $0x10] sm:$0xff]  ;;  %vm53_vm2 = vcmask 58368   ;;  %v786_v15 = vmov 0.0  }
   0x8   :  { %v58_v3 = vld [vmem:[%s989_s0] sm:$0xff]  ;;  %v61_v6 = vld [vmem:[%s989_s0 + $0x18] sm:$0xff]  ;;  %54 = vst.msk [vmem:[#allocation2] sm:$0x3] %vm53_vm2, %v786_v15  ;;  %vm276_vm3 = vcmask 1041409   ;;  %vm278_vm4 = vcmask 1042434  }
   0x9   :  { %100 = vmatpush.msra.mxu0 %v63_v1  ;;  %v870_v7 = vld [vmem:[%s991_s2] ss:$0 sm:$0xff]  ;;  %55 = vst.msk [vmem:[#allocation2 + $0x10] sm:$0x3] %vm53_vm2, %v786_v15  ;;  %vm280_vm5 = vcmask 1043459   ;;  %v701_v31 = vld [vmem:[%s992_s3 + $0x8] sm:$0xff] }
   0xa   :  { %56 = vst.msk [vmem:[#allocation2 + $0xa] sm:$0x3] %vm53_vm2, %v786_v15  ;;  %v304_v32 = vld [vmem:[%s992_s3] sm:$0xff]  ;;  %v706_v33 = vld [vmem:[%s992_s3 + $0x10] sm:$0xff]  ;;  %330 = vmatpush.msra.mxu1 %v701_v31  ;;  %vm282_vm6 = vcmask 1044484   ;;  %vm284_vm7 = vcmask 1045509  }
   0xb   :  { %101 = vmatpush.msra.mxu0 %v62_v2  ;;  %57 = vst.msk [vmem:[#allocation2 + $0x1a] sm:$0x3] %vm53_vm2, %v786_v15  ;;  %359 = vmatpush.msra.mxu2 %v304_v32  ;;  %vm286_vm8 = vcmask 1046534   ;;  %v712_v2 = vld [vmem:[%s992_s3 + $0x20] sm:$0xff]  ;;  %vm288_vm9 = vcmask 1047559   ;;  %vm299_vm10 = vcmask 64512  }
   0xc   :  { %697 = vmatmul.msk.f32.vlgmr.msra.gmra.mxu0 %vm69_vm1, %v58_v3  ;;  %392 = vmatpush.msra.mxu3 %v706_v33  ;;  %v709_v3 = vld [vmem:[%s992_s3 + $0x18] sm:$0xff]  ;;  %vm494_vm11 = vcmask 123904   ;;  %vm576_vm12 = vcmask 1047556   ;;  %s789_s20 = smov 48   ;;  %s790_s21 = smov 16   ;;  %vm604_vm13 = vcmask 130048  }
   0xd   :  { %462 = vmatpush.msrb.mxu2 %v712_v2  ;;  %427 = vmatpush.msrb.mxu1 %v709_v3  ;;  %s791_s22 = smov 32   ;;  %vm606_vm14 = vcmask 261120   ;;  %vm608_vm15 = vcmask 392192   ;;  %vm622_vm0 = vcmask 523264   ;;  %s792_s14 = smov [#allocation6]  }
   0xe   :  { %s684_s15 = sshll.u32 %s792_s14, 4  ;;  %s686_s17 = sshll.u32 %s998_s9, 4  ;;  %s685_s15 = int_to_ptr.vmem [resolvable:$true] %s684_s15  ;;  %s687_s17 = int_to_ptr.hbm [resolvable:$true] %s686_s17 }
  0x14   :  { %698 = vmatmul.msk.f32.gmra.mxu0 %vm69_vm1, %v59_v4 }
  0x1c   :  { %699 = vmatmul.msk.f32.gmra.mxu0 %vm69_vm1, %v60_v5 }
  0x24   :  { %700 = vmatmul.msk.f32.gmra.mxu0 %vm69_vm1, %v61_v6 }
  0x89   :  { %v103_v8 = vpop.f32.mrf.mxu0 }
  0x8a   :  { %v104_v9 = vadd.f32 %v870_v7, %v103_v8 }
  0x8c   :  { %v115_v10 = vmax.f32 %v104_v9, 0.0 }
  0x8e   :  { %v123_v11 = vrot.slane %v115_v10, 2  ;;  %v124_v12 = vrot.slane %v115_v10, 4  ;;  %v125_v13 = vrot.slane %v115_v10, 6  ;;  %v148_v14 = vsel %vm53_vm2, %v115_v10, -inf }
  0x8f   :  { %v149_v16 = vrot.slane %v148_v14, 4 }
  0x90   :  { %v155_v17 = vsel %vm53_vm2, %v123_v11, -inf  ;;  %v162_v18 = vsel %vm53_vm2, %v124_v12, -inf  ;;  %v169_v19 = vsel %vm53_vm2, %v125_v13, -inf }
  0x91   :  { %v150_v20 = vmax.f32 %v148_v14, %v149_v16  ;;  %v156_v21 = vrot.slane %v155_v17, 4  ;;  %v163_v22 = vrot.slane %v162_v18, 4  ;;  %v170_v23 = vrot.slane %v169_v19, 4  ;;  %v106_v24 = vpop.f32.mrf.mxu0 }
  0x92   :  { %v107_v25 = vadd.f32 %v870_v7, %v106_v24 }
  0x93   :  { %v151_v26 = vrot.slane %v150_v20, 2  ;;  %v157_v27 = vmax.f32 %v155_v17, %v156_v21  ;;  %v164_v28 = vmax.f32 %v162_v18, %v163_v22  ;;  %v171_v29 = vmax.f32 %v169_v19, %v170_v23 }
  0x94   :  { %v116_v30 = vmax.f32 %v107_v25, 0.0 }
  0x95   :  { %v152_v34 = vmax.f32 %v150_v20, %v151_v26  ;;  %v158_v35 = vrot.slane %v157_v27, 2  ;;  %v165_v36 = vrot.slane %v164_v28, 2  ;;  %v172_v37 = vrot.slane %v171_v29, 2 }
  0x96   :  { %v126_v38 = vrot.slane %v116_v30, 2  ;;  %v127_v39 = vrot.slane %v116_v30, 4  ;;  %v128_v40 = vrot.slane %v116_v30, 6  ;;  %v176_v41 = vsel %vm53_vm2, %v116_v30, -inf }
  0x97   :  { %v153_v42 = vrot.slane %v152_v34, 1  ;;  %v159_v43 = vmax.f32 %v157_v27, %v158_v35  ;;  %v166_v44 = vmax.f32 %v164_v28, %v165_v36  ;;  %v173_v45 = vmax.f32 %v171_v29, %v172_v37 }
  0x98   :  { %v177_v46 = vrot.slane %v176_v41, 4  ;;  %v183_v47 = vsel %vm53_vm2, %v126_v38, -inf  ;;  %v190_v48 = vsel %vm53_vm2, %v127_v39, -inf  ;;  %v197_v49 = vsel %vm53_vm2, %v128_v40, -inf }
  0x99   :  { %v160_v50 = vrot.slane %v159_v43, 1  ;;  %v167_v51 = vrot.slane %v166_v44, 1  ;;  %v174_v52 = vrot.slane %v173_v45, 1  ;;  %v109_v53 = vpop.f32.mrf.mxu0  ;;  %v184_v55 = vrot.slane %v183_v47, 4 }
  0x9a   :  { %v178_v54 = vmax.f32 %v176_v41, %v177_v46  ;;  %v191_v56 = vrot.slane %v190_v48, 4  ;;  %v198_v57 = vrot.slane %v197_v49, 4  ;;  %v154_v58 = vmax.f32 %v152_v34, %v153_v42 }
  0x9b   :  { %v161_v59 = vmax.f32 %v159_v43, %v160_v50  ;;  %v168_v60 = vmax.f32 %v166_v44, %v167_v51  ;;  %v110_v61 = vadd.f32 %v870_v7, %v109_v53  ;;  %v185_v63 = vmax.f32 %v183_v47, %v184_v55 }
  0x9c   :  { %v179_v62 = vrot.slane %v178_v54, 2  ;;  %v192_v0 = vmax.f32 %v190_v48, %v191_v56  ;;  %v199_v1 = vmax.f32 %v197_v49, %v198_v57  ;;  %v175_v4 = vmax.f32 %v173_v45, %v174_v52 }
  0x9d   :  { %v277_v5 = vsel %vm276_vm3, %v161_v59, %v154_v58  ;;  %v117_v6 = vmax.f32 %v110_v61, 0.0  ;;  %v186_v10 = vrot.slane %v185_v63, 2 }
  0x9e   :  { %v279_v8 = vsel %vm278_vm4, %v168_v60, %v277_v5  ;;  %v180_v9 = vmax.f32 %v178_v54, %v179_v62  ;;  %v193_v11 = vrot.slane %v192_v0, 2  ;;  %v200_v13 = vrot.slane %v199_v1, 2 }
  0x9f   :  { %v281_v12 = vsel %vm280_vm5, %v175_v4, %v279_v8  ;;  %v129_v14 = vrot.slane %v117_v6, 2  ;;  %v130_v15 = vrot.slane %v117_v6, 4  ;;  %v187_v17 = vmax.f32 %v185_v63, %v186_v10 }
  0xa0   :  { %v181_v16 = vrot.slane %v180_v9, 1  ;;  %v194_v18 = vmax.f32 %v192_v0, %v193_v11  ;;  %v131_v19 = vrot.slane %v117_v6, 6  ;;  %v201_v20 = vmax.f32 %v199_v1, %v200_v13 }
  0xa1   :  { %v204_v21 = vsel %vm53_vm2, %v117_v6, -inf  ;;  %v211_v22 = vsel %vm53_vm2, %v129_v14, -inf  ;;  %v218_v23 = vsel %vm53_vm2, %v130_v15, -inf  ;;  %v188_v25 = vrot.slane %v187_v17, 1  ;;  %v112_v32 = vpop.f32.mrf.mxu0 }
  0xa2   :  { %v182_v24 = vmax.f32 %v180_v9, %v181_v16  ;;  %v195_v26 = vrot.slane %v194_v18, 1  ;;  %v205_v27 = vrot.slane %v204_v21, 4  ;;  %v202_v28 = vrot.slane %v201_v20, 1 }
  0xa3   :  { %v212_v29 = vrot.slane %v211_v22, 4  ;;  %v219_v30 = vrot.slane %v218_v23, 4  ;;  %v225_v31 = vsel %vm53_vm2, %v131_v19, -inf  ;;  %v189_v33 = vmax.f32 %v187_v17, %v188_v25 }
  0xa4   :  { %v196_v34 = vmax.f32 %v194_v18, %v195_v26  ;;  %v283_v35 = vsel %vm282_vm6, %v182_v24, %v281_v12  ;;  %v206_v36 = vmax.f32 %v204_v21, %v205_v27  ;;  %v226_v39 = vrot.slane %v225_v31, 4 }
  0xa5   :  { %v213_v37 = vmax.f32 %v211_v22, %v212_v29  ;;  %v220_v38 = vmax.f32 %v218_v23, %v219_v30  ;;  %v203_v40 = vmax.f32 %v201_v20, %v202_v28  ;;  %v285_v41 = vsel %vm284_vm7, %v189_v33, %v283_v35 }
  0xa6   :  { %v207_v42 = vrot.slane %v206_v36, 2  ;;  %v113_v43 = vadd.f32 %v870_v7, %v112_v32  ;;  %v287_v44 = vsel %vm286_vm8, %v196_v34, %v285_v41  ;;  %v227_v47 = vmax.f32 %v225_v31, %v226_v39 }
  0xa7   :  { %v214_v45 = vrot.slane %v213_v37, 2  ;;  %v221_v46 = vrot.slane %v220_v38, 2  ;;  %v289_v48 = vsel %vm288_vm9, %v203_v40, %v287_v44 }
  0xa8   :  { %v208_v49 = vmax.f32 %v206_v36, %v207_v42  ;;  %v118_v50 = vmax.f32 %v113_v43, 0.0  ;;  %300 = vst.msk [vmem:[#allocation2 + $0x2] sm:$0xff] %vm299_vm10, %v289_v48  ;;  %v228_v53 = vrot.slane %v227_v47, 2 }
  0xa9   :  { %v215_v51 = vmax.f32 %v213_v37, %v214_v45  ;;  %v222_v52 = vmax.f32 %v220_v38, %v221_v46 }
  0xaa   :  { %v132_v54 = vrot.slane %v118_v50, 2  ;;  %v133_v55 = vrot.slane %v118_v50, 4  ;;  %v134_v56 = vrot.slane %v118_v50, 6  ;;  %v209_v57 = vrot.slane %v208_v49, 1 }
  0xab   :  { %v216_v58 = vrot.slane %v215_v51, 1  ;;  %v232_v7 = vsel %vm53_vm2, %v118_v50, -inf  ;;  %v223_v59 = vrot.slane %v222_v52, 1  ;;  %v229_v0 = vmax.f32 %v227_v47, %v228_v53 }
  0xac   :  { %v233_v60 = vrot.slane %v232_v7, 4  ;;  %v239_v61 = vsel %vm53_vm2, %v132_v54, -inf  ;;  %v246_v62 = vsel %vm53_vm2, %v133_v55, -inf  ;;  %v253_v4 = vsel %vm53_vm2, %v134_v56, -inf  ;;  %v728_v56 = vld [vmem:[%s993_s4] ss:$0 sm:$0xff] }
  0xad   :  { %v217_v63 = vmax.f32 %v215_v51, %v216_v58  ;;  %v240_v1 = vrot.slane %v239_v61, 4  ;;  %v247_v3 = vrot.slane %v246_v62, 4  ;;  %v210_v5 = vmax.f32 %v208_v49, %v209_v57 }
  0xae   :  { %v234_v2 = vmax.f32 %v232_v7, %v233_v60  ;;  %v254_v8 = vrot.slane %v253_v4, 4  ;;  %v224_v9 = vmax.f32 %v222_v52, %v223_v59  ;;  %v230_v15 = vrot.slane %v229_v0, 1 }
  0xaf   :  { %v241_v6 = vmax.f32 %v239_v61, %v240_v1  ;;  %v248_v11 = vmax.f32 %v246_v62, %v247_v3  ;;  %v305_v12 = vld [vmem:[#allocation2 + $0x1] sm:$0xff]  ;;  %v290_v16 = vsel %vm276_vm3, %v217_v63, %v210_v5 }
  0xb0   :  { %v235_v10 = vrot.slane %v234_v2, 2  ;;  %v302_v13 = vld [vmem:[#allocation2] sm:$0xff]  ;;  %v255_v18 = vmax.f32 %v253_v4, %v254_v8  ;;  %702 = vmatmul.msk.f32.vlgmr.msra.gmra.mxu1 %vm299_vm10, %v305_v12  ;;  %v291_v23 = vsel %vm278_vm4, %v224_v9, %v290_v16  ;;  %v231_v26 = vmax.f32 %v229_v0, %v230_v15 }
  0xb1   :  { %v367_v14 = vld [vmem:[#allocation2 + $0x2] sm:$0xff]  ;;  %v242_v17 = vrot.slane %v241_v6, 2  ;;  %704 = vmatmul.msk.f32.vlgmr.msra.gmra.mxu2 %vm299_vm10, %v302_v13  ;;  %v249_v20 = vrot.slane %v248_v11, 2 }
  0xb2   :  { %v236_v19 = vmax.f32 %v234_v2, %v235_v10  ;;  %707 = vmatmul.msk.f32.vlgmr.msra.gmra.mxu3 %vm299_vm10, %v367_v14  ;;  %v256_v22 = vrot.slane %v255_v18, 2  ;;  %v292_v31 = vsel %vm280_vm5, %v231_v26, %v291_v23  ;;  %v402_v43 = vld [vmem:[#allocation2 + $0x3] sm:$0xff] }
  0xb3   :  { %v243_v21 = vmax.f32 %v241_v6, %v242_v17  ;;  %v250_v25 = vmax.f32 %v248_v11, %v249_v20  ;;  %v437_v44 = vld [vmem:[#allocation2 + $0x4] sm:$0xff] }
  0xb4   :  { %v237_v24 = vrot.slane %v236_v19, 1  ;;  %v257_v28 = vmax.f32 %v255_v18, %v256_v22 }
  0xb5   :  { %v244_v27 = vrot.slane %v243_v21, 1  ;;  %v251_v30 = vrot.slane %v250_v25, 1 }
  0xb6   :  { %v238_v29 = vmax.f32 %v236_v19, %v237_v24  ;;  %v258_v33 = vrot.slane %v257_v28, 1 }
  0xb7   :  { %v245_v32 = vmax.f32 %v243_v21, %v244_v27  ;;  %v252_v34 = vmax.f32 %v250_v25, %v251_v30 }
  0xb8   :  { %v293_v35 = vsel %vm282_vm6, %v238_v29, %v292_v31  ;;  %v259_v36 = vmax.f32 %v257_v28, %v258_v33 }
  0xb9   :  { %v294_v37 = vsel %vm284_vm7, %v245_v32, %v293_v35 }
  0xba   :  { %v295_v38 = vsel %vm286_vm8, %v252_v34, %v294_v37 }
  0xbb   :  { %v296_v39 = vsel %vm288_vm9, %v259_v36, %v295_v38 }
  0xbc   :  { %301 = vst.msk [vmem:[#allocation2 + $0x12] sm:$0xff] %vm299_vm10, %v296_v39 }
  0xc3   :  { %v306_v40 = vld [vmem:[#allocation2 + $0x11] sm:$0xff] }
  0xc4   :  { %v303_v41 = vld [vmem:[#allocation2 + $0x10] sm:$0xff]  ;;  %703 = vmatmul.msk.f32.gmra.mxu1 %vm299_vm10, %v306_v40 }
  0xc5   :  { %v368_v42 = vld [vmem:[#allocation2 + $0x12] sm:$0xff]  ;;  %705 = vmatmul.msk.f32.gmra.mxu2 %vm299_vm10, %v303_v41 }
  0xc6   :  { %708 = vmatmul.msk.f32.gmra.mxu3 %vm299_vm10, %v368_v42  ;;  %v403_v45 = vld [vmem:[#allocation2 + $0x13] sm:$0xff] }
  0xc7   :  { %v438_v46 = vld [vmem:[#allocation2 + $0x14] sm:$0xff] }
  0xcc   :  { %710 = vmatmul.msk.f32.vlgmr.msrb.gmra.mxu1 %vm299_vm10, %v402_v43 }
  0xcd   :  { %713 = vmatmul.msk.f32.vlgmr.msrb.gmra.mxu2 %vm299_vm10, %v437_v44 }
  0xd4   :  { %711 = vmatmul.msk.f32.gmra.mxu1 %vm299_vm10, %v403_v45 }
  0xd5   :  { %714 = vmatmul.msk.f32.gmra.mxu2 %vm299_vm10, %v438_v46 }
 0x12d   :  { %v332_v47 = vpop.f32.mrf.mxu1 }
 0x134   :  { %v361_v48 = vpop.f32.mrf.mxu2 }
 0x135   :  { %v362_v51 = vadd.f32 %v361_v48, %v332_v47  ;;  %v394_v53 = vpop.f32.mrf.mxu3  ;;  %v617_v48 = vld [vmem:[%s994_s5 + $0x38] sm:$0xff] }
 0x136   :  { %634 = vmatpush.msrb.mxu3 %v617_v48 }
 0x137   :  { %v400_v54 = vadd.f32 %v394_v53, %v362_v51 }
 0x141   :  { %v335_v49 = vpop.f32.mrf.mxu1 }
 0x148   :  { %v364_v50 = vpop.f32.mrf.mxu2 }
 0x149   :  { %v429_v52 = vpop.f32.mrf.mxu1  ;;  %v365_v57 = vadd.f32 %v364_v50, %v335_v49  ;;  %v397_v59 = vpop.f32.mrf.mxu3  ;;  %v616_v49 = vld [vmem:[%s994_s5 + $0x30] sm:$0xff] }
 0x14a   :  { %v435_v55 = vadd.f32 %v429_v52, %v400_v54  ;;  %635 = vmatpush.msrb.mxu3 %v616_v49 }
 0x14b   :  { %v401_v62 = vadd.f32 %v397_v59, %v365_v57 }
 0x150   :  { %v464_v58 = vpop.f32.mrf.mxu2 }
 0x151   :  { %v470_v7 = vadd.f32 %v464_v58, %v435_v55  ;;  %v432_v61 = vpop.f32.mrf.mxu1  ;;  %v787_v55 = vmov 1983009808  }
 0x152   :  { %v436_v0 = vadd.f32 %v432_v61, %v401_v62 }
 0x153   :  { %v476_v60 = vadd.f32 %v728_v56, %v470_v7 }
 0x155   :  { %v478_v63 = vmax.f32 %v476_v60, 0.0 }
 0x157   :  { %v482_v1 = vrot.slane %v478_v63, 2  ;;  %v483_v2 = vrot.slane %v478_v63, 4  ;;  %v484_v3 = vrot.slane %v478_v63, 6  ;;  %v495_v4 = vsel %vm494_vm11, %v478_v63, -inf }
 0x158   :  { %v496_v5 = vrot.slane %v495_v4, 4  ;;  %v467_v6 = vpop.f32.mrf.mxu2 }
 0x159   :  { %v502_v8 = vsel %vm494_vm11, %v482_v1, -inf  ;;  %v509_v9 = vsel %vm494_vm11, %v483_v2, -inf  ;;  %v516_v10 = vsel %vm494_vm11, %v484_v3, -inf  ;;  %v471_v11 = vadd.f32 %v467_v6, %v436_v0 }
 0x15a   :  { %v497_v12 = vmax.f32 %v495_v4, %v496_v5  ;;  %v503_v13 = vrot.slane %v502_v8, 4  ;;  %v510_v14 = vrot.slane %v509_v9, 4  ;;  %v517_v15 = vrot.slane %v516_v10, 4 }
 0x15b   :  { %v477_v16 = vadd.f32 %v728_v56, %v471_v11  ;;  %v567_v56 = vunpack.c.l.s4 %v787_v55  ;;  %v788_v11 = vmov 1934713408  }
 0x15c   :  { %v498_v17 = vrot.slane %v497_v12, 2  ;;  %v504_v18 = vmax.f32 %v502_v8, %v503_v13  ;;  %v511_v19 = vmax.f32 %v509_v9, %v510_v14  ;;  %v518_v20 = vmax.f32 %v516_v10, %v517_v15 }
 0x15d   :  { %v479_v21 = vmax.f32 %v477_v16, 0.0  ;;  %v568_v2 = vunpack.c.0.s8 %v567_v56 }
 0x15e   :  { %v499_v22 = vmax.f32 %v497_v12, %v498_v17  ;;  %v505_v23 = vrot.slane %v504_v18, 2  ;;  %v512_v24 = vrot.slane %v511_v19, 2  ;;  %v519_v25 = vrot.slane %v518_v20, 2 }
 0x15f   :  { %v485_v26 = vrot.slane %v479_v21, 2  ;;  %v486_v27 = vrot.slane %v479_v21, 4  ;;  %v487_v28 = vrot.slane %v479_v21, 6  ;;  %v523_v29 = vsel %vm494_vm11, %v479_v21, -inf }
 0x160   :  { %v500_v30 = vrot.slane %v499_v22, 1  ;;  %v506_v31 = vmax.f32 %v504_v18, %v505_v23  ;;  %v513_v32 = vmax.f32 %v511_v19, %v512_v24  ;;  %v520_v33 = vmax.f32 %v518_v20, %v519_v25 }
 0x161   :  { %v524_v34 = vrot.slane %v523_v29, 4  ;;  %v530_v35 = vsel %vm494_vm11, %v485_v26, -inf  ;;  %v537_v36 = vsel %vm494_vm11, %v486_v27, -inf  ;;  %v544_v37 = vsel %vm494_vm11, %v487_v28, -inf }
 0x162   :  { %v507_v38 = vrot.slane %v506_v31, 1  ;;  %v514_v39 = vrot.slane %v513_v32, 1  ;;  %v531_v41 = vrot.slane %v530_v35, 4  ;;  %v538_v42 = vrot.slane %v537_v36, 4 }
 0x163   :  { %v525_v40 = vmax.f32 %v523_v29, %v524_v34  ;;  %v545_v43 = vrot.slane %v544_v37, 4  ;;  %v501_v44 = vmax.f32 %v499_v22, %v500_v30  ;;  %v521_v47 = vrot.slane %v520_v33, 1  ;;  %v615_v30 = vld [vmem:[%s994_s5 + $0x28] sm:$0xff] }
 0x164   :  { %v508_v45 = vmax.f32 %v506_v31, %v507_v38  ;;  %v515_v46 = vmax.f32 %v513_v32, %v514_v39  ;;  %v532_v51 = vmax.f32 %v530_v35, %v531_v41  ;;  %v539_v52 = vmax.f32 %v537_v36, %v538_v42  ;;  %636 = vmatpush.msrb.mxu3 %v615_v30  ;;  %v614_v31 = vld [vmem:[%s994_s5 + $0x20] sm:$0xff]  ;;  %v613_v32 = vld [vmem:[%s994_s5 + $0x18] sm:$0xff]  ;;  %v611_v34 = vld [vmem:[%s994_s5 + $0x8] sm:$0xff] }
 0x165   :  { %v526_v50 = vrot.slane %v525_v40, 2  ;;  %v546_v53 = vmax.f32 %v544_v37, %v545_v43  ;;  %v522_v60 = vmax.f32 %v520_v33, %v521_v47  ;;  %v581_v12 = vunpack.c.l.s4 %v788_v11  ;;  %v612_v33 = vld [vmem:[%s994_s5 + $0x10] sm:$0xff]  ;;  %v610_v35 = vld [vmem:[%s994_s5] sm:$0xff]  ;;  %v650_v36 = vld [vmem:[#allocation3 + $0x18] sm:$0xff] }
 0x166   :  { %v559_v54 = vsel %vm276_vm3, %v508_v45, %v501_v44  ;;  %v533_v58 = vrot.slane %v532_v51, 2  ;;  %v540_v7 = vrot.slane %v539_v52, 2  ;;  %637 = vmatpush.msrb.mxu3 %v614_v31  ;;  %v649_v37 = vld [vmem:[#allocation3 + $0x10] sm:$0xff]  ;;  %v648_v44 = vld [vmem:[#allocation3 + $0x8] sm:$0xff]  ;;  %v647_v45 = vld [vmem:[#allocation3] sm:$0xff] }
 0x167   :  { %v527_v57 = vmax.f32 %v525_v40, %v526_v50  ;;  %v547_v59 = vrot.slane %v546_v53, 2  ;;  %v560_v61 = vsel %vm278_vm4, %v515_v46, %v559_v54  ;;  %v582_v18 = vunpack.c.0.s8 %v581_v12  ;;  %v729_v46 = vld [vmem:[%s995_s6] ss:$0 sm:$0xff] }
 0x168   :  { %v534_v63 = vmax.f32 %v532_v51, %v533_v58  ;;  %v541_v0 = vmax.f32 %v539_v52, %v540_v7  ;;  %v561_v6 = vsel %vm280_vm5, %v522_v60, %v560_v61  ;;  %638 = vmatpush.msrb.mxu3 %v613_v32  ;;  %v730_v50 = vld [vmem:[%s997_s8] ss:$0 sm:$0xff] }
 0x169   :  { %v528_v62 = vrot.slane %v527_v57, 1  ;;  %v548_v1 = vmax.f32 %v546_v53, %v547_v59  ;;  %v569_v13 = vperm.slane %v561_v6, %v568_v2 }
 0x16a   :  { %v535_v3 = vrot.slane %v534_v63, 1  ;;  %v542_v4 = vrot.slane %v541_v0, 1  ;;  %639 = vmatpush.msrb.mxu3 %v612_v33 }
 0x16b   :  { %v549_v5 = vrot.slane %v548_v1, 1  ;;  %v529_v8 = vmax.f32 %v527_v57, %v528_v62  ;;  %v578_v20 = vrot.slane %v569_v13, 4 }
 0x16c   :  { %v536_v9 = vmax.f32 %v534_v63, %v535_v3  ;;  %v543_v10 = vmax.f32 %v541_v0, %v542_v4  ;;  %640 = vmatpush.msrb.mxu3 %v611_v34 }
 0x16d   :  { %v550_v14 = vmax.f32 %v548_v1, %v549_v5 }
 0x16e   :  { %v562_v15 = vsel %vm276_vm3, %v536_v9, %v529_v8  ;;  %641 = vmatpush.msrb.mxu3 %v610_v35 }
 0x16f   :  { %v563_v16 = vsel %vm278_vm4, %v543_v10, %v562_v15 }
 0x170   :  { %v564_v17 = vsel %vm280_vm5, %v550_v14, %v563_v16  ;;  %670 = vmatpush.msra.mxu3 %v650_v36 }
 0x171   :  { %v574_v19 = vperm.slane %v564_v17, %v568_v2 }
 0x172   :  { %671 = vmatpush.msra.mxu3 %v649_v37 }
 0x173   :  { %v579_v21 = vsel %vm576_vm12, %v574_v19, %v578_v20  ;;  %v575_v22 = vrot.slane %v574_v19, 4 }
 0x174   :  { %v587_v23 = vperm.slane %v579_v21, %v582_v18  ;;  %672 = vmatpush.msra.mxu3 %v648_v44 }
 0x175   :  { %v577_v24 = vsel %vm576_vm12, %v575_v22, %v569_v13 }
 0x176   :  { %v590_v25 = vrot.slane %v587_v23, 4  ;;  %v583_v26 = vperm.slane %v577_v24, %v582_v18  ;;  %673 = vmatpush.msra.mxu3 %v647_v45 }
 0x178   :  { %v591_v27 = vsel %vm576_vm12, 0.0, %v590_v25  ;;  %v588_v28 = vrot.slane %v583_v26, 4 }
 0x179   :  { %601 = vrot.lane.b32.xlu1 %v591_v27, %s789_s20 }
 0x17a   :  { %v589_v29 = vsel %vm576_vm12, 0.0, %v588_v28 }
 0x17b   :  { %593 = vrot.lane.b32.xlu0 %v589_v29, %s790_s21 }
 0x183   :  { %597 = vrot.lane.b32.xlu0 %v587_v23, %s791_s22 }
 0x1eb   :  { %v602_v41 = vpop.permute.xlu1 %601 }
 0x1ed   :  { %v594_v38 = vpop.permute.xlu0 %593 }
 0x1ee   :  { %v605_v39 = vsel %vm604_vm13, %v583_v26, %v594_v38 }
 0x1f5   :  { %v598_v40 = vpop.permute.xlu0 %597 }
 0x1f6   :  { %v607_v42 = vsel %vm606_vm14, %v605_v39, %v598_v40 }
 0x1f7   :  { %v609_v43 = vsel %vm608_vm15, %v607_v42, %v602_v41 }
 0x1f8   :  { %715 = vmatmul.msk.f32.vlgmr.msrb.gmra.mxu3 %vm622_vm0, %v609_v43 }
 0x27b   :  { %v643_v47 = vpop.f32.mrf.mxu3 }
 0x27c   :  { %v644_v48 = vadd.f32 %v729_v46, %v643_v47 }
 0x27e   :  { %v646_v49 = vmax.f32 %v644_v48, 0.0 }
 0x280   :  { %716 = vmatmul.msk.f32.vlgmr.msra.gmra.mxu3 %vm606_vm14, %v646_v49 }
 0x303   :  { %v675_v51 = vpop.f32.mrf.mxu3 }
 0x304   :  { %v676_v52 = vadd.f32 %v730_v50, %v675_v51 }
 0x306   :  { %678 = vst [vmem:[#allocation6] sm:$0x3] %v676_v52 }
 0x307   :  { %689 = dma.vmem_to_hbm [thread:$0]  %s685_s15, 32, %s687_s17, [#allocation5]  }
 0x308   :  { %781 = dma.done.wait [#allocation5], 32  }
 0x309   :  { %782 = vsyncadd [#allocation5], 4294967264 }
 0x30a   :  { %694 = vsyncpa [#allocation4], 1 }
 0x30b   :  { %695 = vsyncpa [#allocation5], 1 }

</bundles_post_ra>
